<compile_context>
chip_gen: v6e
topology: v6e:2x2x1
jax: 0.10.0
libtpu: 0.0.40
codegen_flags: <defaults>
</compile_context>

<pallas_src>
import math

import jax
import jax.numpy as jnp
from jax.experimental import pallas as pl
from jax.experimental.pallas import tpu as pltpu

# Pooling configuration (matches nn.MaxPool2d(kernel_size=3, ceil_mode=True)).
KSIZE = 3
STRIDE = 3  # PyTorch default: stride = kernel_size
H_IN, W_IN = 5, 5
# ceil_mode=True output size: ceil((dim - k) / stride) + 1
H_OUT = math.ceil((H_IN - KSIZE) / STRIDE) + 1  # = 2
W_OUT = math.ceil((W_IN - KSIZE) / STRIDE) + 1  # = 2

# Precomputed flattened-row indices (r = h*W_IN + w) for each clipped window,
# in row-major (oh, ow) order.  ceil_mode windows past the edge are clipped to
# the valid region, exactly like PyTorch (no pad values participate).
_WINDOW_ROWS = []
for _oh in range(H_OUT):
    _h0, _h1 = _oh * STRIDE, min(_oh * STRIDE + KSIZE, H_IN)
    for _ow in range(W_OUT):
        _w0, _w1 = _ow * STRIDE, min(_ow * STRIDE + KSIZE, W_IN)
        _WINDOW_ROWS.append(
            [h * W_IN + w for h in range(_h0, _h1) for w in range(_w0, _w1)]
        )


def _maxpool_kernel(x_ref, o_ref):
    # x_ref: (25, TB) in VMEM; o_ref: (4, TB) in VMEM.  B sits on the lane axis,
    # so every window max is a chain of per-lane jnp.maximum ops on the VPU.
    x = x_ref[...]
    outs = []
    for rows in _WINDOW_ROWS:
        m = x[rows[0]:rows[0] + 1, :]
        for r in rows[1:]:
            m = jnp.maximum(m, x[r:r + 1, :])
        outs.append(m)
    # Single unmasked full-block store (lane-dense output).
    o_ref[...] = jnp.concatenate(outs, axis=0)


def _round_up(x, m):
    return ((x + m - 1) // m) * m


def maxpool2d_ceil(x, *, max_tile_b=8192):
    """x: (N, C, 5, 5) float array -> (N, C, 2, 2)."""
    n, c, h, w = x.shape
    assert (h, w) == (H_IN, W_IN), "kernel is specialized to 5x5 inputs"
    b = n * c

    # Lane-dense relayout: spatial (25) on sublanes, B = N*C on lanes.
    xf = x.reshape(b, h * w).T  # (25, B)

    # Tile B in multiples of 128 lanes; pad B so every block is full-size.
    # VMEM per input block at tb=8192: 25x8192 f32 ~= 0.8 MiB (double-buffered
    # ~1.6 MiB) -- comfortably under the scoped limits on v5e/v6e/v7x.
    tb = min(max_tile_b, _round_up(b, 128))
    b_pad = _round_up(b, tb)
    if b_pad != b:
        xf = jnp.pad(xf, ((0, 0), (0, b_pad - b)))

    out = pl.pallas_call(
        _maxpool_kernel,
        out_shape=jax.ShapeDtypeStruct((H_OUT * W_OUT, b_pad), x.dtype),
        grid=(b_pad // tb,),
        in_specs=[pl.BlockSpec((H_IN * W_IN, tb), lambda i: (0, i))],
        out_specs=pl.BlockSpec((H_OUT * W_OUT, tb), lambda i: (0, i)),
        compiler_params=pltpu.CompilerParams(
            dimension_semantics=("parallel",)),
    )(xf)

    out = out[:, :b]  # drop lane padding
    return out.T.reshape(n, c, H_OUT, W_OUT)


def _reference(x):
    # Pure-JAX reference with the same clipped-window semantics.
    outs = []
    for oh in range(H_OUT):
        h0, h1 = oh * STRIDE, min(oh * STRIDE + KSIZE, H_IN)
        row = []
        for ow in range(W_OUT):
            w0, w1 = ow * STRIDE, min(ow * STRIDE + KSIZE, W_IN)
            row.append(jnp.max(x[:, :, h0:h1, w0:w1], axis=(2, 3)))
        outs.append(jnp.stack(row, axis=-1))
    return jnp.stack(outs, axis=-2)


if __name__ == "__main__":
    key = jax.random.PRNGKey(0)

    # Mirror `torch.reshape(input, (-1, 1, 5, 5))`: flat input -> NCHW.
    flat = jax.random.normal(key, (2 * 1 * H_IN * W_IN,), dtype=jnp.float32)
    x_small = flat.reshape(-1, 1, H_IN, W_IN)  # (2, 1, 5, 5)

    y = maxpool2d_ceil(x_small)
    jax.block_until_ready(y)
    assert y.shape == (2, 1, H_OUT, W_OUT)
    assert jnp.allclose(y, _reference(x_small)), "Pallas maxpool mismatch (small)"

    # A slightly larger case to exercise lane padding / lane-dense layout.
    k2 = jax.random.PRNGKey(1)
    x_big = jax.random.normal(k2, (3, 100, H_IN, W_IN), dtype=jnp.float32)
    y_big = maxpool2d_ceil(x_big)
    jax.block_until_ready(y_big)
    assert y_big.shape == (3, 100, H_OUT, W_OUT)
    assert jnp.allclose(y_big, _reference(x_big)), "Pallas maxpool mismatch (big)"

    print("KERNEL_OK")
</pallas_src>

<mosaic_0001>
module attributes {stable_mosaic.version = 11 : i64} {
  func.func @_maxpool_kernel(%arg0: i32, %arg1: memref<25x128xf32, #tpu.memory_space<vmem>>, %arg2: memref<4x128xf32, #tpu.memory_space<vmem>>) attributes {dimension_semantics = [#tpu.dimension_semantics<parallel>], iteration_bounds = array<i64: 1>, scalar_prefetch = 0 : i64, scratch_operands = 0 : i64, tpu.core_type = #tpu.core_type<tc>, window_params = [{transform_indices = @transform_0, window_bounds = array<i64: 25, 128>}, {transform_indices = @transform_1, window_bounds = array<i64: 4, 128>}]} {
    %c0 = arith.constant 0 : index
    %c0_0 = arith.constant 0 : index
    %0 = vector.load %arg1[%c0, %c0_0] : memref<25x128xf32, #tpu.memory_space<vmem>>, vector<25x128xf32>
    %1 = vector.extract_strided_slice %0 {offsets = [0, 0], sizes = [1, 128], strides = [1, 1]} : vector<25x128xf32> to vector<1x128xf32>
    %2 = vector.extract_strided_slice %0 {offsets = [1, 0], sizes = [1, 128], strides = [1, 1]} : vector<25x128xf32> to vector<1x128xf32>
    %3 = arith.maximumf %1, %2 : vector<1x128xf32>
    %4 = vector.extract_strided_slice %0 {offsets = [2, 0], sizes = [1, 128], strides = [1, 1]} : vector<25x128xf32> to vector<1x128xf32>
    %5 = arith.maximumf %3, %4 : vector<1x128xf32>
    %6 = vector.extract_strided_slice %0 {offsets = [5, 0], sizes = [1, 128], strides = [1, 1]} : vector<25x128xf32> to vector<1x128xf32>
    %7 = arith.maximumf %5, %6 : vector<1x128xf32>
    %8 = vector.extract_strided_slice %0 {offsets = [6, 0], sizes = [1, 128], strides = [1, 1]} : vector<25x128xf32> to vector<1x128xf32>
    %9 = arith.maximumf %7, %8 : vector<1x128xf32>
    %10 = vector.extract_strided_slice %0 {offsets = [7, 0], sizes = [1, 128], strides = [1, 1]} : vector<25x128xf32> to vector<1x128xf32>
    %11 = arith.maximumf %9, %10 : vector<1x128xf32>
    %12 = vector.extract_strided_slice %0 {offsets = [10, 0], sizes = [1, 128], strides = [1, 1]} : vector<25x128xf32> to vector<1x128xf32>
    %13 = arith.maximumf %11, %12 : vector<1x128xf32>
    %14 = vector.extract_strided_slice %0 {offsets = [11, 0], sizes = [1, 128], strides = [1, 1]} : vector<25x128xf32> to vector<1x128xf32>
    %15 = arith.maximumf %13, %14 : vector<1x128xf32>
    %16 = vector.extract_strided_slice %0 {offsets = [12, 0], sizes = [1, 128], strides = [1, 1]} : vector<25x128xf32> to vector<1x128xf32>
    %17 = arith.maximumf %15, %16 : vector<1x128xf32>
    %18 = vector.extract_strided_slice %0 {offsets = [3, 0], sizes = [1, 128], strides = [1, 1]} : vector<25x128xf32> to vector<1x128xf32>
    %19 = vector.extract_strided_slice %0 {offsets = [4, 0], sizes = [1, 128], strides = [1, 1]} : vector<25x128xf32> to vector<1x128xf32>
    %20 = arith.maximumf %18, %19 : vector<1x128xf32>
    %21 = vector.extract_strided_slice %0 {offsets = [8, 0], sizes = [1, 128], strides = [1, 1]} : vector<25x128xf32> to vector<1x128xf32>
    %22 = arith.maximumf %20, %21 : vector<1x128xf32>
    %23 = vector.extract_strided_slice %0 {offsets = [9, 0], sizes = [1, 128], strides = [1, 1]} : vector<25x128xf32> to vector<1x128xf32>
    %24 = arith.maximumf %22, %23 : vector<1x128xf32>
    %25 = vector.extract_strided_slice %0 {offsets = [13, 0], sizes = [1, 128], strides = [1, 1]} : vector<25x128xf32> to vector<1x128xf32>
    %26 = arith.maximumf %24, %25 : vector<1x128xf32>
    %27 = vector.extract_strided_slice %0 {offsets = [14, 0], sizes = [1, 128], strides = [1, 1]} : vector<25x128xf32> to vector<1x128xf32>
    %28 = arith.maximumf %26, %27 : vector<1x128xf32>
    %29 = vector.extract_strided_slice %0 {offsets = [15, 0], sizes = [1, 128], strides = [1, 1]} : vector<25x128xf32> to vector<1x128xf32>
    %30 = vector.extract_strided_slice %0 {offsets = [16, 0], sizes = [1, 128], strides = [1, 1]} : vector<25x128xf32> to vector<1x128xf32>
    %31 = arith.maximumf %29, %30 : vector<1x128xf32>
    %32 = vector.extract_strided_slice %0 {offsets = [17, 0], sizes = [1, 128], strides = [1, 1]} : vector<25x128xf32> to vector<1x128xf32>
    %33 = arith.maximumf %31, %32 : vector<1x128xf32>
    %34 = vector.extract_strided_slice %0 {offsets = [20, 0], sizes = [1, 128], strides = [1, 1]} : vector<25x128xf32> to vector<1x128xf32>
    %35 = arith.maximumf %33, %34 : vector<1x128xf32>
    %36 = vector.extract_strided_slice %0 {offsets = [21, 0], sizes = [1, 128], strides = [1, 1]} : vector<25x128xf32> to vector<1x128xf32>
    %37 = arith.maximumf %35, %36 : vector<1x128xf32>
    %38 = vector.extract_strided_slice %0 {offsets = [22, 0], sizes = [1, 128], strides = [1, 1]} : vector<25x128xf32> to vector<1x128xf32>
    %39 = arith.maximumf %37, %38 : vector<1x128xf32>
    %40 = vector.extract_strided_slice %0 {offsets = [18, 0], sizes = [1, 128], strides = [1, 1]} : vector<25x128xf32> to vector<1x128xf32>
    %41 = vector.extract_strided_slice %0 {offsets = [19, 0], sizes = [1, 128], strides = [1, 1]} : vector<25x128xf32> to vector<1x128xf32>
    %42 = arith.maximumf %40, %41 : vector<1x128xf32>
    %43 = vector.extract_strided_slice %0 {offsets = [23, 0], sizes = [1, 128], strides = [1, 1]} : vector<25x128xf32> to vector<1x128xf32>
    %44 = arith.maximumf %42, %43 : vector<1x128xf32>
    %45 = vector.extract_strided_slice %0 {offsets = [24, 0], sizes = [1, 128], strides = [1, 1]} : vector<25x128xf32> to vector<1x128xf32>
    %46 = arith.maximumf %44, %45 : vector<1x128xf32>
    %47 = tpu.concatenate %17, %28, %39, %46 in 0 : vector<1x128xf32>, vector<1x128xf32>, vector<1x128xf32>, vector<1x128xf32> -> vector<4x128xf32>
    %c0_1 = arith.constant 0 : index
    %c0_2 = arith.constant 0 : index
    %48 = vector.load %arg2[%c0_1, %c0_2] : memref<4x128xf32, #tpu.memory_space<vmem>>, vector<4x128xf32>
    tpu.vector_store %arg2[%c0_1, %c0_2], %47 {strides = array<i32>} : memref<4x128xf32, #tpu.memory_space<vmem>>, vector<4x128xf32>,
    return
  }
  func.func @transform_0(%arg0: i32) -> (i32, i32) {
    %c0_i32 = arith.constant 0 : i32
    %c0_i32_0 = arith.constant 0 : i32
    return %c0_i32, %arg0 : i32, i32
  }
  func.func @transform_1(%arg0: i32) -> (i32, i32) {
    %c0_i32 = arith.constant 0 : i32
    %c0_i32_0 = arith.constant 0 : i32
    return %c0_i32, %arg0 : i32, i32
  }
}

</mosaic_0001>

<bundles_post_ra>
// kernel: tpu_custom_call.1
= control target key start
LH: loop header
LB: loop body
LE: loop exit
PB: predicated region body
PF: predicated region fallthrough
CT: control target
= control target key end

     0   :  { %6 = vsyncpa [#allocation3], 0  ;;  %s182_s0 = inlined_call_operand.hbm [shape: f32[25,128], index: 0, kind: input, shape index: {}]   ;;  %s183_s1 = inlined_call_operand.hbm [shape: f32[4,128], index: 1, kind: output, shape index: {}]  }
   0x1   :  { %7 = vsyncpa [#allocation4], 0  ;;  %s162_s6 = smov [#allocation2]  }
   0x2   :  { %s13_s7 = sshll.u32 %s162_s6, 4  ;;  %s14_s7 = int_to_ptr.vmem [resolvable:$true] %s13_s7 }
   0x3   :  { %s126_s8 = scalar_lea.vmem %s14_s7, 512  ;;  %p131_p1 = scmp.lt.s32.totalorder %s14_s7, %s14_s7 }
   0x4   :  { %p127_p0 = scmp.ne.s32.totalorder %s14_s7, %s126_s8  ;;  %p132_p2 = scmp.lt.s32.totalorder %s126_s8, %s126_s8 }
   0x6   :  { %p133_p3 = por %p132_p2, %p131_p1 }
   0x8   :  { %p134_p4 = pnand %p133_p3, %p127_p0 }
   0xa   :  { %137 = shalt.err (!%p134_p4)
}
   0xb   :  { %s163_s9 = smov 128   ;;  %s164_s10 = smov 8  }
   0xc   :  { %19 = dma.hbm_to_vmem [thread:$0]  %s182_s0, 512, %s14_s7, [#allocation3], %s163_s9, %s163_s9, %s164_s10  }
   0xd   :  { %158 = dma.done.wait [#allocation3], 512  }
   0xe   :  { %159 = vsyncadd [#allocation3], 4294966784  ;;  %v23_v0 = vld [vmem:[#allocation2] sm:$0xff]  ;;  %v24_v1 = vld [vmem:[#allocation2 + $0x8] sm:$0xff]  ;;  %vm92_vm0 = vcmask 1040384   ;;  %vm94_vm1 = vcmask 1041408  }
   0xf   :  { %v25_v2 = vld [vmem:[#allocation2 + $0x10] sm:$0xff]  ;;  %v28_v3 = vrot.slane %v23_v0, 1  ;;  %v31_v4 = vrot.slane %v23_v0, 2  ;;  %v34_v5 = vrot.slane %v23_v0, 5  ;;  %v53_v7 = vrot.slane %v24_v1, 5  ;;  %s165_s0 = smov [#allocation5]  }
  0x10   :  { %v56_v8 = vrot.slane %v24_v1, 6  ;;  %v62_v9 = vrot.slane %v25_v2, 1  ;;  %v37_v10 = vrot.slane %v23_v0, 6  ;;  %v44_v11 = vrot.slane %v24_v1, 2  ;;  %v26_v14 = vld [vmem:[#allocation2 + $0x18] sm:$0x1] }
  0x11   :  { %v30_v6 = vmax.f32 %v23_v0, %v28_v3  ;;  %v65_v12 = vrot.slane %v25_v2, 2  ;;  %v68_v13 = vrot.slane %v25_v2, 5  ;;  %v40_v19 = vrot.slane %v23_v0, 7  ;;  %s105_s13 = sshll.u32 %s165_s0, 4  ;;  %s106_s13 = int_to_ptr.vmem [resolvable:$true] %s105_s13 }
  0x12   :  { %v64_v17 = vmax.f32 %v24_v1, %v62_v9  ;;  %v77_v18 = vmax.f32 %v25_v2, %v62_v9  ;;  %v47_v20 = vrot.slane %v24_v1, 3  ;;  %v71_v24 = vrot.slane %v25_v2, 6  ;;  %s138_s14 = scalar_lea.vmem %s106_s13, 64  ;;  %p143_p6 = scmp.lt.s32.totalorder %s106_s13, %s106_s13 }
  0x13   :  { %v33_v15 = vmax.f32 %v30_v6, %v31_v4  ;;  %v55_v16 = vmax.f32 %v30_v6, %v53_v7  ;;  %v74_v25 = vrot.slane %v25_v2, 7  ;;  %v80_v26 = vrot.slane %v26_v14, 6  ;;  %p139_p5 = scmp.ne.s32.totalorder %s106_s13, %s138_s14  ;;  %p144_p7 = scmp.lt.s32.totalorder %s138_s14, %s138_s14 }
  0x14   :  { %v67_v23 = vmax.f32 %v64_v17, %v65_v12  ;;  %v78_v30 = vmax.f32 %v77_v18, %v68_v13  ;;  %v50_v35 = vrot.slane %v24_v1, 4  ;;  %vm96_vm2 = vcmask 1042432  }
  0x15   :  { %v36_v21 = vmax.f32 %v33_v15, %v34_v5  ;;  %v58_v22 = vmax.f32 %v55_v16, %v56_v8  ;;  %p145_p8 = por %p144_p7, %p143_p6 }
  0x16   :  { %v70_v29 = vmax.f32 %v67_v23, %v68_v13  ;;  %v82_v37 = vmax.f32 %v78_v30, %v80_v26 }
  0x17   :  { %v39_v27 = vmax.f32 %v36_v21, %v37_v10  ;;  %v59_v28 = vmax.f32 %v58_v22, %v44_v11  ;;  %p146_p9 = pnand %p145_p8, %p139_p5 }
  0x18   :  { %v73_v33 = vmax.f32 %v70_v29, %v71_v24  ;;  %v90_v42 = vrot.slane %v82_v37, 7 }
  0x19   :  { %v42_v31 = vmax.f32 %v39_v27, %v40_v19  ;;  %v60_v32 = vmax.f32 %v59_v28, %v47_v20 }
  0x1a   :  { %v76_v36 = vmax.f32 %v73_v33, %v74_v25 }
  0x1b   :  { %v46_v34 = vmax.f32 %v42_v31, %v44_v11  ;;  %v84_v39 = vrot.slane %v60_v32, 2 }
  0x1c   :  { %v87_v40 = vrot.slane %v76_v36, 5 }
  0x1d   :  { %v49_v38 = vmax.f32 %v46_v34, %v47_v20 }
  0x1f   :  { %v52_v41 = vmax.f32 %v49_v38, %v50_v35 }
  0x21   :  { %v93_v43 = vsel %vm92_vm0, %v52_v41, %v84_v39 }
  0x22   :  { %v95_v44 = vsel %vm94_vm1, %v93_v43, %v87_v40 }
  0x23   :  { %v97_v45 = vsel %vm96_vm2, %v95_v44, %v90_v42 }
  0x24   :  { %98 = vst [vmem:[#allocation5] sm:$0xf] %v97_v45 }
  0x25   :  { %149 = shalt.err (!%p146_p9)
}
  0x26   :  { %108 = dma.vmem_to_hbm [thread:$0]  %s106_s13, 64, %s183_s1, [#allocation4]  }
  0x27   :  { %160 = dma.done.wait [#allocation4], 64  }
  0x28   :  { %161 = vsyncadd [#allocation4], 4294967232 }
  0x29   :  { %112 = vsyncpa [#allocation3], 1 }
  0x2a   :  { %113 = vsyncpa [#allocation4], 1 }

</bundles_post_ra>
